<compile_context>
chip_gen: v6e
topology: v6e:2x2x1
jax: 0.10.0
libtpu: 0.0.40
codegen_flags: <defaults>
</compile_context>

<pallas_src>
import jax
import jax.numpy as jnp
from jax.experimental import pallas as pl
from jax.experimental.pallas import tpu as pltpu

_EPS = 1e-12           # PyTorch default eps for F.normalize
_EPS_SQ = _EPS * _EPS
_UNROLL_C_MAX = 32     # unroll the per-channel-slab loop only for small C


def _l2_normalize_kernel(x_ref, o_ref):
    # Block shape: (b_t, C, s_t, 128). Reduction is over axis=1 (channels).
    C = x_ref.shape[1]
    if C <= _UNROLL_C_MAX:
        # Per-slab accumulation: never keeps a full-block f32 copy of x live.
        x0 = x_ref[:, 0].astype(jnp.float32)
        sq = x0 * x0
        for c in range(1, C):
            xc = x_ref[:, c].astype(jnp.float32)
            sq = sq + xc * xc                                   # (b_t, s_t, 128)
        # max(sqrt(s), eps) == sqrt(max(s, eps^2)); rsqrt -> broadcast multiply.
        inv = jax.lax.rsqrt(jnp.maximum(sq, _EPS_SQ))
        for c in range(C):
            o_ref[:, c] = (x_ref[:, c].astype(jnp.float32) * inv).astype(o_ref.dtype)
    else:
        # Large-C fallback: whole-block reduce (budget already accounts for C).
        # TODO(synk): for very large C, tile C over a third grid axis with a
        # two-pass VMEM accumulator instead of a whole-block f32 temp.
        xf = x_ref[...].astype(jnp.float32)
        sq = jnp.sum(xf * xf, axis=1, keepdims=True)
        inv = jax.lax.rsqrt(jnp.maximum(sq, _EPS_SQ))
        o_ref[...] = (xf * inv).astype(o_ref.dtype)


def _round_up(x, m):
    return ((x + m - 1) // m) * m


def _largest_divisor_leq(n, cap):
    cap = int(min(max(cap, 1), n))
    for d in range(cap, 0, -1):
        if n % d == 0:
            return d
    return 1


def _vmem_plan(itemsize):
    """Per-generation VMEM limit + per-block byte budget."""
    try:
        vmem_cap = int(pltpu.get_tpu_info().vmem_capacity_bytes)
    except Exception:
        vmem_cap = 64 << 20  # conservative (v7x-sized) fallback
    # Explicit scoped limit: 3/4 of physical, capped at 64 MiB (ample for this op).
    # v7x (64 MiB phys) -> 48 MiB; v5e/v6e (128 MiB phys) -> 64 MiB.
    vmem_limit = int(min((vmem_cap * 3) // 4, 64 << 20))
    # Live VMEM ~= 2x(in+out) double-buffered native blocks + f32 temporaries.
    f32_ratio = max(1, 4 // max(1, itemsize))
    denom = 4 + 2 * f32_ratio + 2            # +2 blocks of slack
    block_budget = int(min(vmem_limit // denom, 4 << 20))   # target ~4 MiB blocks
    return vmem_limit, max(block_budget, 128 * 1024)


def _choose_spatial_tile(S, max_rows):
    """Pick sublane tile s_t <= max_rows; prefer divisors of S (no padding)."""
    if S <= max_rows:
        return S                               # full extent: always legal, no pad
    cap = max(8, (max_rows // 8) * 8)          # sublane dim must be multiple of 8
    for d in range(cap, 7, -8):                # prefer an exact divisor -> no pad
        if S % d == 0:
            return d
    return cap                                 # ragged: one pad pass will fire


def normalize(x):
    """Equivalent of torch.nn.functional.normalize(x) (p=2, dim=1) for NC... tensors."""
    assert x.ndim >= 2, "normalize expects at least (N, C)"
    orig_shape = x.shape
    B, C = orig_shape[0], orig_shape[1]
    HW = 1
    for d in orig_shape[2:]:
        HW *= int(d)

    itemsize = jnp.dtype(x.dtype).itemsize
    vmem_limit, block_budget = _vmem_plan(itemsize)

    S = _round_up(HW, 128) // 128              # sublane rows of lane-dense layout
    per_row_bytes = C * 128 * itemsize
    per_batch_bytes = S * per_row_bytes

    if per_batch_bytes <= block_budget:
        # Full spatial extent per block; fold batches to amortize per-step overhead.
        s_t = S
        b_cap = max(1, block_budget // per_batch_bytes)
        if per_batch_bytes >= 256 * 1024:
            # Keep >= 2 blocks for v7x's two TensorCores when data is non-trivial.
            b_cap = min(b_cap, max(1, B // 2))
        b_t = _largest_divisor_leq(B, b_cap)
    else:
        b_t = 1
        max_rows = max(1, block_budget // per_row_bytes)
        s_t = _choose_spatial_tile(S, max_rows)

    S_pad = _round_up(S, s_t)
    HW_pad = S_pad * 128

    x_flat = x.reshape(B, C, HW)
    if HW_pad != HW:
        # Single pad pass: lane padding and spatial-tile padding in one copy.
        x_flat = jnp.pad(x_flat, ((0, 0), (0, 0), (0, HW_pad - HW)))
    x4 = x_flat.reshape(B, C, S_pad, 128)

    grid = (B // b_t, S_pad // s_t)
    block = (b_t, C, s_t, 128)

    out = pl.pallas_call(
        _l2_normalize_kernel,
        out_shape=jax.ShapeDtypeStruct((B, C, S_pad, 128), x.dtype),
        grid=grid,
        in_specs=[pl.BlockSpec(block, lambda b, s: (b, 0, s, 0))],
        out_specs=pl.BlockSpec(block, lambda b, s: (b, 0, s, 0)),
        compiler_params=pltpu.CompilerParams(
            dimension_semantics=("parallel", "parallel"),
            vmem_limit_bytes=vmem_limit,
        ),
    )(x4)

    out = out.reshape(B, C, HW_pad)
    if HW_pad != HW:
        out = out[:, :, :HW]
    return out.reshape(orig_shape)


def _reference(x):
    norm = jnp.sqrt(jnp.sum(x.astype(jnp.float32) ** 2, axis=1, keepdims=True))
    return (x.astype(jnp.float32) / jnp.maximum(norm, _EPS)).astype(x.dtype)


if __name__ == "__main__":
    key = jax.random.PRNGKey(0)

    # Small NCHW input consistent with the module's forward pass.
    x = jax.random.normal(key, (2, 4, 16, 16), dtype=jnp.float32)
    y = jax.block_until_ready(normalize(x))
    y_ref = _reference(x)
    assert jnp.allclose(y, y_ref, atol=1e-6, rtol=1e-5), "mismatch vs reference (16x16)"

    # Extra check: non-multiple-of-128 spatial size exercises the padding path.
    x2 = jax.random.normal(jax.random.PRNGKey(1), (2, 4, 10, 10), dtype=jnp.float32)
    y2 = jax.block_until_ready(normalize(x2))
    y2_ref = _reference(x2)
    assert jnp.allclose(y2, y2_ref, atol=1e-6, rtol=1e-5), "mismatch vs reference (10x10)"

    print("KERNEL_OK")
</pallas_src>

<mosaic_0001>
module attributes {stable_mosaic.version = 11 : i64} {
  func.func @_l2_normalize_kernel(%arg0: i32, %arg1: i32, %arg2: memref<2x4x2x128xf32, #tpu.memory_space<vmem>>, %arg3: memref<2x4x2x128xf32, #tpu.memory_space<vmem>>) attributes {dimension_semantics = [#tpu.dimension_semantics<parallel>, #tpu.dimension_semantics<parallel>], iteration_bounds = array<i64: 1, 1>, scalar_prefetch = 0 : i64, scratch_operands = 0 : i64, tpu.core_type = #tpu.core_type<tc>, window_params = [{transform_indices = @transform_0, window_bounds = array<i64: 2, 4, 2, 128>}, {transform_indices = @transform_1, window_bounds = array<i64: 2, 4, 2, 128>}]} {
    %c0 = arith.constant 0 : index
    %c0_0 = arith.constant 0 : index
    %c0_1 = arith.constant 0 : index
    %c0_2 = arith.constant 0 : index
    %0 = vector.load %arg2[%c0, %c0_0, %c0_1, %c0_2] : memref<2x4x2x128xf32, #tpu.memory_space<vmem>>, vector<2x1x2x128xf32>
    %1 = vector.shape_cast %0 : vector<2x1x2x128xf32> to vector<2x2x128xf32>
    %2 = arith.mulf %1, %1 : vector<2x2x128xf32>
    %c0_3 = arith.constant 0 : index
    %c1 = arith.constant 1 : index
    %c0_4 = arith.constant 0 : index
    %c0_5 = arith.constant 0 : index
    %3 = vector.load %arg2[%c0_3, %c1, %c0_4, %c0_5] : memref<2x4x2x128xf32, #tpu.memory_space<vmem>>, vector<2x1x2x128xf32>
    %4 = vector.shape_cast %3 : vector<2x1x2x128xf32> to vector<2x2x128xf32>
    %5 = arith.mulf %4, %4 : vector<2x2x128xf32>
    %6 = arith.addf %2, %5 : vector<2x2x128xf32>
    %c0_6 = arith.constant 0 : index
    %c2 = arith.constant 2 : index
    %c0_7 = arith.constant 0 : index
    %c0_8 = arith.constant 0 : index
    %7 = vector.load %arg2[%c0_6, %c2, %c0_7, %c0_8] : memref<2x4x2x128xf32, #tpu.memory_space<vmem>>, vector<2x1x2x128xf32>
    %8 = vector.shape_cast %7 : vector<2x1x2x128xf32> to vector<2x2x128xf32>
    %9 = arith.mulf %8, %8 : vector<2x2x128xf32>
    %10 = arith.addf %6, %9 : vector<2x2x128xf32>
    %c0_9 = arith.constant 0 : index
    %c3 = arith.constant 3 : index
    %c0_10 = arith.constant 0 : index
    %c0_11 = arith.constant 0 : index
    %11 = vector.load %arg2[%c0_9, %c3, %c0_10, %c0_11] : memref<2x4x2x128xf32, #tpu.memory_space<vmem>>, vector<2x1x2x128xf32>
    %12 = vector.shape_cast %11 : vector<2x1x2x128xf32> to vector<2x2x128xf32>
    %13 = arith.mulf %12, %12 : vector<2x2x128xf32>
    %14 = arith.addf %10, %13 : vector<2x2x128xf32>
    %cst = arith.constant 1.000000e-24 : f32
    %15 = vector.broadcast %cst : f32 to vector<2x2x128xf32>
    %16 = arith.maximumf %14, %15 : vector<2x2x128xf32>
    %17 = math.rsqrt %16 : vector<2x2x128xf32>
    %c0_12 = arith.constant 0 : index
    %c0_13 = arith.constant 0 : index
    %c0_14 = arith.constant 0 : index
    %c0_15 = arith.constant 0 : index
    %18 = vector.load %arg2[%c0_12, %c0_13, %c0_14, %c0_15] : memref<2x4x2x128xf32, #tpu.memory_space<vmem>>, vector<2x1x2x128xf32>
    %19 = vector.shape_cast %18 : vector<2x1x2x128xf32> to vector<2x2x128xf32>
    %20 = arith.mulf %19, %17 : vector<2x2x128xf32>
    %c0_16 = arith.constant 0 : index
    %c0_17 = arith.constant 0 : index
    %c0_18 = arith.constant 0 : index
    %c0_19 = arith.constant 0 : index
    %21 = vector.load %arg3[%c0_16, %c0_17, %c0_18, %c0_19] : memref<2x4x2x128xf32, #tpu.memory_space<vmem>>, vector<2x1x2x128xf32>
    %22 = vector.shape_cast %21 : vector<2x1x2x128xf32> to vector<2x2x128xf32>
    %23 = vector.shape_cast %20 : vector<2x2x128xf32> to vector<2x1x2x128xf32>
    tpu.vector_store %arg3[%c0_16, %c0_17, %c0_18, %c0_19], %23 {strides = array<i32>} : memref<2x4x2x128xf32, #tpu.memory_space<vmem>>, vector<2x1x2x128xf32>,
    %c0_20 = arith.constant 0 : index
    %c1_21 = arith.constant 1 : index
    %c0_22 = arith.constant 0 : index
    %c0_23 = arith.constant 0 : index
    %24 = vector.load %arg2[%c0_20, %c1_21, %c0_22, %c0_23] : memref<2x4x2x128xf32, #tpu.memory_space<vmem>>, vector<2x1x2x128xf32>
    %25 = vector.shape_cast %24 : vector<2x1x2x128xf32> to vector<2x2x128xf32>
    %26 = arith.mulf %25, %17 : vector<2x2x128xf32>
    %c0_24 = arith.constant 0 : index
    %c1_25 = arith.constant 1 : index
    %c0_26 = arith.constant 0 : index
    %c0_27 = arith.constant 0 : index
    %27 = vector.load %arg3[%c0_24, %c1_25, %c0_26, %c0_27] : memref<2x4x2x128xf32, #tpu.memory_space<vmem>>, vector<2x1x2x128xf32>
    %28 = vector.shape_cast %27 : vector<2x1x2x128xf32> to vector<2x2x128xf32>
    %29 = vector.shape_cast %26 : vector<2x2x128xf32> to vector<2x1x2x128xf32>
    tpu.vector_store %arg3[%c0_24, %c1_25, %c0_26, %c0_27], %29 {strides = array<i32>} : memref<2x4x2x128xf32, #tpu.memory_space<vmem>>, vector<2x1x2x128xf32>,
    %c0_28 = arith.constant 0 : index
    %c2_29 = arith.constant 2 : index
    %c0_30 = arith.constant 0 : index
    %c0_31 = arith.constant 0 : index
    %30 = vector.load %arg2[%c0_28, %c2_29, %c0_30, %c0_31] : memref<2x4x2x128xf32, #tpu.memory_space<vmem>>, vector<2x1x2x128xf32>
    %31 = vector.shape_cast %30 : vector<2x1x2x128xf32> to vector<2x2x128xf32>
    %32 = arith.mulf %31, %17 : vector<2x2x128xf32>
    %c0_32 = arith.constant 0 : index
    %c2_33 = arith.constant 2 : index
    %c0_34 = arith.constant 0 : index
    %c0_35 = arith.constant 0 : index
    %33 = vector.load %arg3[%c0_32, %c2_33, %c0_34, %c0_35] : memref<2x4x2x128xf32, #tpu.memory_space<vmem>>, vector<2x1x2x128xf32>
    %34 = vector.shape_cast %33 : vector<2x1x2x128xf32> to vector<2x2x128xf32>
    %35 = vector.shape_cast %32 : vector<2x2x128xf32> to vector<2x1x2x128xf32>
    tpu.vector_store %arg3[%c0_32, %c2_33, %c0_34, %c0_35], %35 {strides = array<i32>} : memref<2x4x2x128xf32, #tpu.memory_space<vmem>>, vector<2x1x2x128xf32>,
    %c0_36 = arith.constant 0 : index
    %c3_37 = arith.constant 3 : index
    %c0_38 = arith.constant 0 : index
    %c0_39 = arith.constant 0 : index
    %36 = vector.load %arg2[%c0_36, %c3_37, %c0_38, %c0_39] : memref<2x4x2x128xf32, #tpu.memory_space<vmem>>, vector<2x1x2x128xf32>
    %37 = vector.shape_cast %36 : vector<2x1x2x128xf32> to vector<2x2x128xf32>
    %38 = arith.mulf %37, %17 : vector<2x2x128xf32>
    %c0_40 = arith.constant 0 : index
    %c3_41 = arith.constant 3 : index
    %c0_42 = arith.constant 0 : index
    %c0_43 = arith.constant 0 : index
    %39 = vector.load %arg3[%c0_40, %c3_41, %c0_42, %c0_43] : memref<2x4x2x128xf32, #tpu.memory_space<vmem>>, vector<2x1x2x128xf32>
    %40 = vector.shape_cast %39 : vector<2x1x2x128xf32> to vector<2x2x128xf32>
    %41 = vector.shape_cast %38 : vector<2x2x128xf32> to vector<2x1x2x128xf32>
    tpu.vector_store %arg3[%c0_40, %c3_41, %c0_42, %c0_43], %41 {strides = array<i32>} : memref<2x4x2x128xf32, #tpu.memory_space<vmem>>, vector<2x1x2x128xf32>,
    return
  }
  func.func @transform_0(%arg0: i32, %arg1: i32) -> (i32, i32, i32, i32) {
    %c0_i32 = arith.constant 0 : i32
    %c0_i32_0 = arith.constant 0 : i32
    %c0_i32_1 = arith.constant 0 : i32
    return %arg0, %c0_i32, %arg1, %c0_i32_0 : i32, i32, i32, i32
  }
  func.func @transform_1(%arg0: i32, %arg1: i32) -> (i32, i32, i32, i32) {
    %c0_i32 = arith.constant 0 : i32
    %c0_i32_0 = arith.constant 0 : i32
    %c0_i32_1 = arith.constant 0 : i32
    return %arg0, %c0_i32, %arg1, %c0_i32_0 : i32, i32, i32, i32
  }
}

</mosaic_0001>

<bundles_post_ra>
// kernel: tpu_custom_call.1
= control target key start
LH: loop header
LB: loop body
LE: loop exit
PB: predicated region body
PF: predicated region fallthrough
CT: control target
= control target key end

     0   :  { %6 = vsyncpa [#allocation3], 0  ;;  %s172_s0 = inlined_call_operand.hbm [shape: f32[2,4,2,128], index: 0, kind: input, shape index: {}]   ;;  %s173_s1 = inlined_call_operand.hbm [shape: f32[2,4,2,128], index: 1, kind: output, shape index: {}]  }
   0x1   :  { %7 = vsyncpa [#allocation4], 0  ;;  %s146_s6 = smov [#allocation2]  }
   0x2   :  { %s13_s7 = sshll.u32 %s146_s6, 4  ;;  %s14_s7 = int_to_ptr.vmem [resolvable:$true] %s13_s7 }
   0x3   :  { %s110_s8 = scalar_lea.vmem %s14_s7, 256  ;;  %p115_p1 = scmp.lt.s32.totalorder %s14_s7, %s14_s7 }
   0x4   :  { %p111_p0 = scmp.ne.s32.totalorder %s14_s7, %s110_s8  ;;  %p116_p2 = scmp.lt.s32.totalorder %s110_s8, %s110_s8 }
   0x6   :  { %p117_p3 = por %p116_p2, %p115_p1 }
   0x8   :  { %p118_p4 = pnand %p117_p3, %p111_p0 }
   0xa   :  { %121 = shalt.err (!%p118_p4)
}
   0xb   :  { %s147_s9 = smov 32   ;;  %s148_s10 = smov 2  }
   0xc   :  { %19 = dma.hbm_to_vmem [thread:$0]  %s172_s0, 256, %s14_s7, [#allocation3], %s147_s9, %s147_s9, %s148_s10  }
   0xd   :  { %142 = dma.done.wait [#allocation3], 256  }
   0xe   :  { %143 = vsyncadd [#allocation3], 4294967040  ;;  %v23_v0 = vld [vmem:[#allocation2] sm:$0x3]  ;;  %v28_v1 = vld [vmem:[#allocation2 + $0x2] sm:$0x3] }
   0xf   :  { %v35_v2 = vld [vmem:[#allocation2 + $0x4] sm:$0x3]  ;;  %v25_v3 = vmul.f32 %v23_v0, %v23_v0  ;;  %v30_v4 = vmul.f32 %v28_v1, %v28_v1  ;;  %v42_v6 = vld [vmem:[#allocation2 + $0x6] sm:$0x3]  ;;  %v24_v7 = vld [vmem:[#allocation2 + $0x8] sm:$0x3] }
  0x10   :  { %v37_v5 = vmul.f32 %v35_v2, %v35_v2  ;;  %v29_v8 = vld [vmem:[#allocation2 + $0xa] sm:$0x3]  ;;  %v26_v9 = vmul.f32 %v24_v7, %v24_v7  ;;  %v36_v11 = vld [vmem:[#allocation2 + $0xc] sm:$0x3]  ;;  %v43_v12 = vld [vmem:[#allocation2 + $0xe] sm:$0x3]  ;;  %v44_v14 = vmul.f32 %v42_v6, %v42_v6 }
  0x11   :  { %v31_v10 = vmul.f32 %v29_v8, %v29_v8  ;;  %v32_v13 = vadd.f32 %v30_v4, %v25_v3  ;;  %v38_v15 = vmul.f32 %v36_v11, %v36_v11  ;;  %v45_v17 = vmul.f32 %v43_v12, %v43_v12  ;;  %s149_s0 = smov [#allocation5]   ;;  %v56_v24 = vld [vmem:[#allocation2 + $0x2] sm:$0x3]  ;;  %v63_v25 = vld [vmem:[#allocation2 + $0x4] sm:$0x3] }
  0x12   :  { %s82_s13 = sshll.u32 %s149_s0, 4  ;;  %v70_v26 = vld [vmem:[#allocation2 + $0x6] sm:$0x3]  ;;  %v57_v27 = vld [vmem:[#allocation2 + $0xa] sm:$0x3]  ;;  %s83_s13 = int_to_ptr.vmem [resolvable:$true] %s82_s13 }
  0x13   :  { %v33_v16 = vadd.f32 %v31_v10, %v26_v9  ;;  %v39_v18 = vadd.f32 %v37_v5, %v32_v13  ;;  %v64_v28 = vld [vmem:[#allocation2 + $0xc] sm:$0x3]  ;;  %v71_v29 = vld [vmem:[#allocation2 + $0xe] sm:$0x3]  ;;  %s122_s14 = scalar_lea.vmem %s83_s13, 256  ;;  %p127_p6 = scmp.lt.s32.totalorder %s83_s13, %s83_s13 }
  0x14   :  { %p123_p5 = scmp.ne.s32.totalorder %s83_s13, %s122_s14  ;;  %p128_p7 = scmp.lt.s32.totalorder %s122_s14, %s122_s14 }
  0x15   :  { %v40_v19 = vadd.f32 %v38_v15, %v33_v16  ;;  %v46_v20 = vadd.f32 %v44_v14, %v39_v18 }
  0x16   :  { %p129_p8 = por %p128_p7, %p127_p6 }
  0x17   :  { %v47_v21 = vadd.f32 %v45_v17, %v40_v19  ;;  %v48_v22 = vmax.f32 %v46_v20, 1e-24 }
  0x18   :  { %p130_p9 = pnand %p129_p8, %p123_p5 }
  0x19   :  { %v49_v23 = vmax.f32 %v47_v21, 1e-24  ;;  %98 = vrsqrt.f32 %v48_v22 }
  0x1b   :  { %100 = vrsqrt.f32 %v49_v23 }
  0x26   :  { %v99_v30 = vpop.eup %98 }
  0x27   :  { %v52_v32 = vmul.f32 %v99_v30, %v23_v0  ;;  %v58_v33 = vmul.f32 %v99_v30, %v56_v24  ;;  %v65_v34 = vmul.f32 %v99_v30, %v63_v25  ;;  %v72_v35 = vmul.f32 %v99_v30, %v70_v26 }
  0x28   :  { %v101_v31 = vpop.eup %100 }
  0x29   :  { %v53_v36 = vmul.f32 %v101_v31, %v24_v7  ;;  %v59_v37 = vmul.f32 %v101_v31, %v57_v27  ;;  %v66_v38 = vmul.f32 %v101_v31, %v64_v28  ;;  %v73_v39 = vmul.f32 %v101_v31, %v71_v29  ;;  %54 = vst [vmem:[#allocation5] sm:$0x3] %v52_v32 }
  0x2a   :  { %61 = vst [vmem:[#allocation5 + $0x2] sm:$0x3] %v58_v33  ;;  %68 = vst [vmem:[#allocation5 + $0x4] sm:$0x3] %v65_v34 }
  0x2b   :  { %75 = vst [vmem:[#allocation5 + $0x6] sm:$0x3] %v72_v35  ;;  %55 = vst [vmem:[#allocation5 + $0x8] sm:$0x3] %v53_v36 }
  0x2c   :  { %62 = vst [vmem:[#allocation5 + $0xa] sm:$0x3] %v59_v37  ;;  %69 = vst [vmem:[#allocation5 + $0xc] sm:$0x3] %v66_v38 }
  0x2d   :  { %76 = vst [vmem:[#allocation5 + $0xe] sm:$0x3] %v73_v39 }
  0x2e   :  { %133 = shalt.err (!%p130_p9)
}
  0x2f   :  { %88 = dma.vmem_to_hbm [thread:$0]  %s83_s13, 256, %s173_s1, [#allocation4], %s147_s9, %s147_s9, %s148_s10  }
  0x30   :  { %144 = dma.done.wait [#allocation4], 256  }
  0x31   :  { %145 = vsyncadd [#allocation4], 4294967040 }
  0x32   :  { %92 = vsyncpa [#allocation3], 1 }
  0x33   :  { %93 = vsyncpa [#allocation4], 1 }

</bundles_post_ra>
